<compile_context>
chip_gen: v5e
topology: v5e:2x2
jax: 0.10.0
libtpu: 0.0.40
codegen_flags: <defaults>
</compile_context>

<pallas_src>
import jax
import jax.numpy as jnp
from jax.experimental import pallas as pl
from jax.experimental.pallas import tpu as pltpu


def _round_up(n, m):
    return ((n + m - 1) // m) * m


def netf_kernel(x_ref, y_ref, w1_ref, b1_ref, w2_ref, b2_ref,
                w3_ref, b3_ref, w4_ref, b4_ref, o_ref):
    # Layers 1 & 2: two small MXU matmuls (bf16 operands, f32 accumulation),
    # bias + relu on the VPU, then add.  Zero-padded hidden cols stay 0.
    a1 = jnp.dot(x_ref[...].astype(w1_ref.dtype), w1_ref[...],
                 preferred_element_type=jnp.float32)
    a2 = jnp.dot(y_ref[...].astype(w2_ref.dtype), w2_ref[...],
                 preferred_element_type=jnp.float32)
    a = jnp.maximum(a1 + b1_ref[...], 0.0) + jnp.maximum(a2 + b2_ref[...], 0.0)

    # Layer 3: (bt, H1P) @ (H1P, H2P) on the MXU, bias + relu in f32.
    h = jnp.dot(a.astype(w3_ref.dtype), w3_ref[...],
                preferred_element_type=jnp.float32)
    h = jnp.maximum(h + b3_ref[...], 0.0)                    # (bt, H2P) f32

    # Layer 4 (out_features = 1): VPU multiply + lane (XLU) reduction.
    # Stored lane-dense: out[g, j] = result for batch row g*128 + j, so the
    # output tile is a compact (bt//128, 128) slab (unmasked vst, 4 B/row).
    g, lanes = o_ref.shape                                   # (bt // 128, 128)
    h3 = h.reshape(g, lanes, h.shape[-1])                    # free sublane split
    red = jnp.sum(h3 * w4_ref[...], axis=-1) + b4_ref[0]     # (g, 128)
    o_ref[...] = red


def pack_params(params, *, compute_dtype=jnp.bfloat16):
    """Pack (in,out)-layout Linear params into the 128-padded kernel layout.

    Matmul weights are pre-cast to `compute_dtype` (default bf16: native MXU
    path, half the resident/HBM weight bytes).  Biases and the fc4 row stay
    f32; padding is exact (padded rows/cols and biases are zero, relu(0)=0).
    """
    w1, b1, w2, b2, w3, b3, w4, b4 = params
    in1, h1 = w1.shape
    in2 = w2.shape[0]
    h2 = w3.shape[1]
    H1P = _round_up(h1, 128)
    H2P = _round_up(h2, 128)

    w1p = jnp.zeros((in1, H1P), jnp.float32).at[:, :h1].set(w1).astype(compute_dtype)
    w2p = jnp.zeros((in2, H1P), jnp.float32).at[:, :h1].set(w2).astype(compute_dtype)
    w3p = jnp.zeros((H1P, H2P), jnp.float32).at[:h1, :h2].set(w3).astype(compute_dtype)
    b1p = jnp.zeros((1, H1P), jnp.float32).at[0, :h1].set(b1.reshape(-1))
    b2p = jnp.zeros((1, H1P), jnp.float32).at[0, :h1].set(b2.reshape(-1))
    b3p = jnp.zeros((1, H2P), jnp.float32).at[0, :h2].set(b3.reshape(-1))
    w4row = jnp.zeros((1, H2P), jnp.float32).at[0, :h2].set(w4.reshape(-1))
    b4s = jnp.asarray(b4, jnp.float32).reshape((1,))          # scalar -> SMEM
    return (w1p, b1p, w2p, b2p, w3p, b3p, w4row, b4s)


def netf_forward(x, y, packed, *, block_b=2048):
    """x: (B, in1), y: (B, in2) -> (B, 1). `packed` from pack_params()."""
    w1p, b1p, w2p, b2p, w3p, b3p, w4row, b4s = packed
    B, IN1 = x.shape
    IN2 = y.shape[1]

    # Batch tile: multiple of 128 (lane-dense compact output).  Cap so there
    # are >= 2 grid tiles when the batch allows it (v7x: 2 TensorCores; a
    # single grid step would leave one idle).
    bp128 = _round_up(B, 128)
    bt = max(128, min(_round_up(block_b, 128), bp128))
    if bp128 >= 2 * 128 and bp128 // bt < 2:
        bt = _round_up(bp128 // 2, 128)
    Bp = _round_up(B, bt)
    n_tiles = Bp // bt
    G = bt // 128

    if Bp != B:  # only the remainder tile pays for this; no-op when bt | B
        x = jnp.pad(x, ((0, Bp - B), (0, 0)))
        y = jnp.pad(y, ((0, Bp - B), (0, 0)))

    out = pl.pallas_call(
        netf_kernel,
        out_shape=jax.ShapeDtypeStruct((n_tiles, G, 128), jnp.float32),
        grid=(n_tiles,),
        in_specs=[
            pl.BlockSpec((bt, IN1), lambda i: (i, 0)),      # x, batch-tiled
            pl.BlockSpec((bt, IN2), lambda i: (i, 0)),      # y, batch-tiled
            pl.BlockSpec(w1p.shape, lambda i: (0, 0)),      # weights stay resident
            pl.BlockSpec(b1p.shape, lambda i: (0, 0)),
            pl.BlockSpec(w2p.shape, lambda i: (0, 0)),
            pl.BlockSpec(b2p.shape, lambda i: (0, 0)),
            pl.BlockSpec(w3p.shape, lambda i: (0, 0)),
            pl.BlockSpec(b3p.shape, lambda i: (0, 0)),
            pl.BlockSpec(w4row.shape, lambda i: (0, 0)),
            pl.BlockSpec(memory_space=pltpu.MemorySpace.SMEM),  # b4 scalar
        ],
        out_specs=pl.BlockSpec((None, G, 128), lambda i: (i, 0, 0)),
        compiler_params=pltpu.CompilerParams(
            dimension_semantics=("parallel",),  # megacore / v7x 2-TC sharding
        ),
    )(x, y, w1p, b1p, w2p, b2p, w3p, b3p, w4row, b4s)

    # out[i, g, j] holds the result for batch row i*bt + g*128 + j.
    return out.reshape(-1)[:B].reshape(B, 1)


def init_params(key, input_size1=32, input_size2=32,
                hidden_size1=100, hidden_size2=100, bias_std=0.0):
    k1, k2, k3, k4, k5, k6, k7, k8 = jax.random.split(key, 8)
    std = 0.02
    # PyTorch nn.Linear weight is (out, in); store transposed (in, out).
    w1 = (jax.random.normal(k1, (hidden_size1, input_size1), jnp.float32) * std).T
    w2 = (jax.random.normal(k2, (hidden_size1, input_size2), jnp.float32) * std).T
    w3 = (jax.random.normal(k3, (hidden_size2, hidden_size1), jnp.float32) * std).T
    w4 = (jax.random.normal(k4, (1, hidden_size2), jnp.float32) * std).T
    b1 = jax.random.normal(k5, (1, hidden_size1), jnp.float32) * bias_std
    b2 = jax.random.normal(k6, (1, hidden_size1), jnp.float32) * bias_std
    b3 = jax.random.normal(k7, (1, hidden_size2), jnp.float32) * bias_std
    b4 = jax.random.normal(k8, (1, 1), jnp.float32) * bias_std
    return (w1, b1, w2, b2, w3, b3, w4, b4)


def reference_forward(x, y, params):
    w1, b1, w2, b2, w3, b3, w4, b4 = params
    out1 = jax.nn.relu(x @ w1 + b1)
    out2 = jax.nn.relu(y @ w2 + b2)
    h = jax.nn.relu((out1 + out2) @ w3 + b3)
    return h @ w4 + b4


if __name__ == "__main__":
    key = jax.random.PRNGKey(0)
    kp, kx, ky = jax.random.split(key, 3)

    B, IN1, IN2, H1, H2 = 256, 32, 32, 100, 100
    # NetF initializes biases to 0; small random biases here only so the
    # numerical check exercises the bias plumbing.
    params = init_params(kp, IN1, IN2, H1, H2, bias_std=0.02)
    packed = pack_params(params)              # bf16 matmul weights, f32 biases

    x = jax.random.normal(kx, (B, IN1), jnp.float32)
    y = jax.random.normal(ky, (B, IN2), jnp.float32)

    # B=256 -> two 128-row batch tiles: exercises the grid path and keeps both
    # v7x TensorCores busy.
    out = jax.block_until_ready(netf_forward(x, y, packed))
    ref = jax.block_until_ready(reference_forward(x, y, params))

    assert out.shape == (B, 1), out.shape
    # bf16 matmul operands (same rounding the TPU DEFAULT precision applies to
    # f32 operands anyway); accumulation is f32 -> bf16-level tolerance.
    max_err = float(jnp.max(jnp.abs(out - ref)))
    assert jnp.allclose(out, ref, atol=2e-3, rtol=2e-2), max_err
    print("KERNEL_OK")
</pallas_src>

<mosaic_0001>
module attributes {stable_mosaic.version = 11 : i64} {
  func.func @netf_kernel(%arg0: i32, %arg1: memref<128x32xf32, #tpu.memory_space<vmem>>, %arg2: memref<128x32xf32, #tpu.memory_space<vmem>>, %arg3: memref<32x128xbf16, #tpu.memory_space<vmem>>, %arg4: memref<1x128xf32, #tpu.memory_space<vmem>>, %arg5: memref<32x128xbf16, #tpu.memory_space<vmem>>, %arg6: memref<1x128xf32, #tpu.memory_space<vmem>>, %arg7: memref<128x128xbf16, #tpu.memory_space<vmem>>, %arg8: memref<1x128xf32, #tpu.memory_space<vmem>>, %arg9: memref<1x128xf32, #tpu.memory_space<vmem>>, %arg10: memref<1xf32, #tpu.memory_space<smem>>, %arg11: memref<1x1x128xf32, #tpu.memory_space<vmem>>) attributes {dimension_semantics = [#tpu.dimension_semantics<parallel>], iteration_bounds = array<i64: 2>, scalar_prefetch = 0 : i64, scratch_operands = 0 : i64, tpu.core_type = #tpu.core_type<tc>, window_params = [{transform_indices = @transform_0, window_bounds = array<i64: 128, 32>}, {transform_indices = @transform_1, window_bounds = array<i64: 128, 32>}, {pipeline_mode = #tpu.pipeline_mode<synchronous>, transform_indices = @transform_2, window_bounds = array<i64: 32, 128>}, {pipeline_mode = #tpu.pipeline_mode<synchronous>, transform_indices = @transform_3, window_bounds = array<i64: 1, 128>}, {pipeline_mode = #tpu.pipeline_mode<synchronous>, transform_indices = @transform_4, window_bounds = array<i64: 32, 128>}, {pipeline_mode = #tpu.pipeline_mode<synchronous>, transform_indices = @transform_5, window_bounds = array<i64: 1, 128>}, {pipeline_mode = #tpu.pipeline_mode<synchronous>, transform_indices = @transform_6, window_bounds = array<i64: 128, 128>}, {pipeline_mode = #tpu.pipeline_mode<synchronous>, transform_indices = @transform_7, window_bounds = array<i64: 1, 128>}, {pipeline_mode = #tpu.pipeline_mode<synchronous>, transform_indices = @transform_8, window_bounds = array<i64: 1, 128>}, {transform_indices = @transform_9, window_bounds = array<i64: 1>}, {transform_indices = @transform_10, window_bounds = array<i64: 1, 1, 128>}]} {
    %c0 = arith.constant 0 : index
    %c0_0 = arith.constant 0 : index
    %0 = vector.load %arg1[%c0, %c0_0] : memref<128x32xf32, #tpu.memory_space<vmem>>, vector<128x32xf32>
    %1 = arith.truncf %0 : vector<128x32xf32> to vector<128x32xbf16>
    %c0_1 = arith.constant 0 : index
    %c0_2 = arith.constant 0 : index
    %2 = vector.load %arg3[%c0_1, %c0_2] : memref<32x128xbf16, #tpu.memory_space<vmem>>, vector<32x128xbf16>
    %cst = arith.constant dense<0.000000e+00> : vector<128x128xf32>
    %3 = tpu.matmul %1, %2, %cst {dimension_numbers = #tpu.dot_dimension_numbers<[1], [0], [0], [1], [0, 0, 1, 1], [], []>} : vector<128x32xbf16>, vector<32x128xbf16>, vector<128x128xf32> -> vector<128x128xf32>
    %c0_3 = arith.constant 0 : index
    %c0_4 = arith.constant 0 : index
    %4 = vector.load %arg2[%c0_3, %c0_4] : memref<128x32xf32, #tpu.memory_space<vmem>>, vector<128x32xf32>
    %5 = arith.truncf %4 : vector<128x32xf32> to vector<128x32xbf16>
    %c0_5 = arith.constant 0 : index
    %c0_6 = arith.constant 0 : index
    %6 = vector.load %arg5[%c0_5, %c0_6] : memref<32x128xbf16, #tpu.memory_space<vmem>>, vector<32x128xbf16>
    %cst_7 = arith.constant dense<0.000000e+00> : vector<128x128xf32>
    %7 = tpu.matmul %5, %6, %cst_7 {dimension_numbers = #tpu.dot_dimension_numbers<[1], [0], [0], [1], [0, 0, 1, 1], [], []>} : vector<128x32xbf16>, vector<32x128xbf16>, vector<128x128xf32> -> vector<128x128xf32>
    %c0_8 = arith.constant 0 : index
    %c0_9 = arith.constant 0 : index
    %8 = vector.load %arg4[%c0_8, %c0_9] : memref<1x128xf32, #tpu.memory_space<vmem>>, vector<1x128xf32>
    %9 = vector.broadcast %8 : vector<1x128xf32> to vector<128x128xf32>
    %10 = arith.addf %3, %9 : vector<128x128xf32>
    %cst_10 = arith.constant 0.000000e+00 : f32
    %11 = vector.broadcast %cst_10 : f32 to vector<128x128xf32>
    %12 = arith.maximumf %10, %11 : vector<128x128xf32>
    %c0_11 = arith.constant 0 : index
    %c0_12 = arith.constant 0 : index
    %13 = vector.load %arg6[%c0_11, %c0_12] : memref<1x128xf32, #tpu.memory_space<vmem>>, vector<1x128xf32>
    %14 = vector.broadcast %13 : vector<1x128xf32> to vector<128x128xf32>
    %15 = arith.addf %7, %14 : vector<128x128xf32>
    %cst_13 = arith.constant 0.000000e+00 : f32
    %16 = vector.broadcast %cst_13 : f32 to vector<128x128xf32>
    %17 = arith.maximumf %15, %16 : vector<128x128xf32>
    %18 = arith.addf %12, %17 : vector<128x128xf32>
    %19 = arith.truncf %18 : vector<128x128xf32> to vector<128x128xbf16>
    %c0_14 = arith.constant 0 : index
    %c0_15 = arith.constant 0 : index
    %20 = vector.load %arg7[%c0_14, %c0_15] : memref<128x128xbf16, #tpu.memory_space<vmem>>, vector<128x128xbf16>
    %cst_16 = arith.constant dense<0.000000e+00> : vector<128x128xf32>
    %21 = tpu.matmul %19, %20, %cst_16 {dimension_numbers = #tpu.dot_dimension_numbers<[1], [0], [0], [1], [0, 0, 1, 1], [], []>} : vector<128x128xbf16>, vector<128x128xbf16>, vector<128x128xf32> -> vector<128x128xf32>
    %c0_17 = arith.constant 0 : index
    %c0_18 = arith.constant 0 : index
    %22 = vector.load %arg8[%c0_17, %c0_18] : memref<1x128xf32, #tpu.memory_space<vmem>>, vector<1x128xf32>
    %23 = vector.broadcast %22 : vector<1x128xf32> to vector<128x128xf32>
    %24 = arith.addf %21, %23 : vector<128x128xf32>
    %cst_19 = arith.constant 0.000000e+00 : f32
    %25 = vector.broadcast %cst_19 : f32 to vector<128x128xf32>
    %26 = arith.maximumf %24, %25 : vector<128x128xf32>
    %27 = vector.shape_cast %26 : vector<128x128xf32> to vector<1x128x128xf32>
    %c0_20 = arith.constant 0 : index
    %c0_21 = arith.constant 0 : index
    %28 = vector.load %arg9[%c0_20, %c0_21] : memref<1x128xf32, #tpu.memory_space<vmem>>, vector<1x128xf32>
    %29 = vector.shape_cast %28 : vector<1x128xf32> to vector<1x1x128xf32>
    %30 = vector.broadcast %29 : vector<1x1x128xf32> to vector<1x128x128xf32>
    %31 = arith.mulf %27, %30 : vector<1x128x128xf32>
    %cst_22 = arith.constant dense<0.000000e+00> : vector<1x128xf32>
    %32 = vector.multi_reduction <add>, %31, %cst_22 [2] : vector<1x128x128xf32> to vector<1x128xf32>
    %c0_23 = arith.constant 0 : index
    %33 = memref.load %arg10[%c0_23] : memref<1xf32, #tpu.memory_space<smem>>
    %34 = vector.broadcast %33 : f32 to vector<1x128xf32>
    %35 = arith.addf %32, %34 : vector<1x128xf32>
    %c0_24 = arith.constant 0 : index
    %c0_25 = arith.constant 0 : index
    %c0_26 = arith.constant 0 : index
    %36 = vector.load %arg11[%c0_24, %c0_25, %c0_26] : memref<1x1x128xf32, #tpu.memory_space<vmem>>, vector<1x1x128xf32>
    %37 = vector.shape_cast %36 : vector<1x1x128xf32> to vector<1x128xf32>
    %38 = vector.shape_cast %35 : vector<1x128xf32> to vector<1x1x128xf32>
    tpu.vector_store %arg11[%c0_24, %c0_25, %c0_26], %38 {strides = array<i32>} : memref<1x1x128xf32, #tpu.memory_space<vmem>>, vector<1x1x128xf32>,
    return
  }
  func.func @transform_0(%arg0: i32) -> (i32, i32) {
    %c0_i32 = arith.constant 0 : i32
    %c0_i32_0 = arith.constant 0 : i32
    return %arg0, %c0_i32 : i32, i32
  }
  func.func @transform_1(%arg0: i32) -> (i32, i32) {
    %c0_i32 = arith.constant 0 : i32
    %c0_i32_0 = arith.constant 0 : i32
    return %arg0, %c0_i32 : i32, i32
  }
  func.func @transform_2(%arg0: i32) -> (i32, i32) {
    %c0_i32 = arith.constant 0 : i32
    %c0_i32_0 = arith.constant 0 : i32
    %c0_i32_1 = arith.constant 0 : i32
    return %c0_i32, %c0_i32_0 : i32, i32
  }
  func.func @transform_3(%arg0: i32) -> (i32, i32) {
    %c0_i32 = arith.constant 0 : i32
    %c0_i32_0 = arith.constant 0 : i32
    %c0_i32_1 = arith.constant 0 : i32
    return %c0_i32, %c0_i32_0 : i32, i32
  }
  func.func @transform_4(%arg0: i32) -> (i32, i32) {
    %c0_i32 = arith.constant 0 : i32
    %c0_i32_0 = arith.constant 0 : i32
    %c0_i32_1 = arith.constant 0 : i32
    return %c0_i32, %c0_i32_0 : i32, i32
  }
  func.func @transform_5(%arg0: i32) -> (i32, i32) {
    %c0_i32 = arith.constant 0 : i32
    %c0_i32_0 = arith.constant 0 : i32
    %c0_i32_1 = arith.constant 0 : i32
    return %c0_i32, %c0_i32_0 : i32, i32
  }
  func.func @transform_6(%arg0: i32) -> (i32, i32) {
    %c0_i32 = arith.constant 0 : i32
    %c0_i32_0 = arith.constant 0 : i32
    %c0_i32_1 = arith.constant 0 : i32
    return %c0_i32, %c0_i32_0 : i32, i32
  }
  func.func @transform_7(%arg0: i32) -> (i32, i32) {
    %c0_i32 = arith.constant 0 : i32
    %c0_i32_0 = arith.constant 0 : i32
    %c0_i32_1 = arith.constant 0 : i32
    return %c0_i32, %c0_i32_0 : i32, i32
  }
  func.func @transform_8(%arg0: i32) -> (i32, i32) {
    %c0_i32 = arith.constant 0 : i32
    %c0_i32_0 = arith.constant 0 : i32
    %c0_i32_1 = arith.constant 0 : i32
    return %c0_i32, %c0_i32_0 : i32, i32
  }
  func.func @transform_9(%arg0: i32) -> i32 {
    %c0_i32 = arith.constant 0 : i32
    %c0_i32_0 = arith.constant 0 : i32
    return %c0_i32 : i32
  }
  func.func @transform_10(%arg0: i32) -> (i32, i32, i32) {
    %c0_i32 = arith.constant 0 : i32
    %c0_i32_0 = arith.constant 0 : i32
    %c0_i32_1 = arith.constant 0 : i32
    return %arg0, %c0_i32, %c0_i32_0 : i32, i32, i32
  }
}

</mosaic_0001>

<bundles_post_ra>
// kernel: tpu_custom_call.1
= control target key start
LH: loop header
LB: loop body
LE: loop exit
PB: predicated region body
PF: predicated region fallthrough
CT: control target
= control target key end

     0   :  { %s1603_s0 = inlined_call_operand.vmem [shape: f32[256,32], index: 0, kind: input, shape index: {}]   ;;  %s1604_s1 = inlined_call_operand.vmem [shape: f32[256,32], index: 1, kind: input, shape index: {}]   ;;  %s1605_s2 = inlined_call_operand.vmem [shape: bf16[32,128], index: 2, kind: input, shape index: {}]   ;;  %s1606_s3 = inlined_call_operand.vmem [shape: f32[1,128], index: 3, kind: input, shape index: {}]   ;;  %s1607_s4 = inlined_call_operand.vmem [shape: bf16[32,128], index: 4, kind: input, shape index: {}]   ;;  %s1608_s5 = inlined_call_operand.vmem [shape: f32[1,128], index: 5, kind: input, shape index: {}]   ;;  %s1609_s6 = inlined_call_operand.vmem [shape: bf16[128,128], index: 6, kind: input, shape index: {}]   ;;  %s1610_s7 = inlined_call_operand.vmem [shape: f32[1,128], index: 7, kind: input, shape index: {}]   ;;  %s1611_s8 = inlined_call_operand.vmem [shape: f32[1,128], index: 8, kind: input, shape index: {}]   ;;  %s1612_s9 = inlined_call_operand.<no memory space> [shape: f32[1], index: 9, kind: input, shape index: {}]   ;;  %s1613_s10 = inlined_call_operand.hbm [shape: f32[2,1,128], index: 10, kind: output, shape index: {}]  }
   0x1   :  { %15 = sst [smem:[#allocation2]] %s1612_s9 }
   0x2   :  { %16 = vsyncpa [#allocation4], 0 }
   0x3   :  { %18 = vsyncpa [#allocation4 + $0x1], 0  ;;  %s1297_s15 = smov 0   ;;  %s1299_s16 = smov 0  }
   0x4   :  { %s1301_s17 = smov 0   ;;  %s1303_s18 = smov 0  }
   0x5 LB: > { %s1318_s9 = sadd.s32 4294967295, %s1237_s18   ;;  %s1038_s19 = sadd.s32 4294967294, %s1237_s18   ;;  %s1237_s18 = sphi %s1303_s18, %s1619_s18   ;;  %s1233_s17 = sphi %s1301_s17, %s1618_s17   ;;  %s1229_s16 = sphi %s1299_s16, %s1617_s16   ;;  %s1225_s15 = sphi %s1297_s15, %s1616_s15  }
   0x6   : > { %s1322_s20 = sadd.s32 1, %s1237_s18   ;;  %s251_s21 = sadd.s32 1, %s1233_s17 }
   0x7   : > { %s248_s22 = ssub.s32 %s1237_s18, %s1322_s20  ;;  %p261_p0 = scmp.ne.s32.totalorder %s1233_s17, %s1229_s16 }
   0x8   : > { %p249_p1 = scmp.eq.s32.totalorder %s248_s22, 0  ;;  %p262_p2 = scmp.eq.s32.totalorder %s1318_s9, 1 }
   0x9   : > { %p267_p3 = scmp.ne.s32.totalorder %s1229_s16, %s1225_s15  ;;  %p268_p4 = scmp.eq.s32.totalorder %s1038_s19, 1 }
   0xa   : > { %s1333_s23 = scalar_select %p249_p1, %s1233_s17, %s251_s21  }
   0xb   : > { %p1335_p5 = por %p262_p2, %p261_p0  ;;  %p1339_p6 = por %p268_p4, %p267_p3 }
   0xc   : > { %p1041_p7 = scmp.ge.s32.totalorder %s1237_s18, 1  ;;  %p328_p8 = scmp.lt.s32.totalorder %s1237_s18, 3 }
   0xe   : > { %p329_p9 = pnand %p1041_p7, %p328_p8 }
   0xf   : > { %s1042_s30 = sshll.u32 (!%p329_p9), %s1318_s9, 4  ;;  %s859_s12 = sld [smem:[#allocation2]] (!%p329_p9) }
  0x10   : > { %332 = sbr.rel (%p329_p9) target bundleno = 554 (0x22a), region = 60  ;;  %p371_p10 = scmp.lt.s32.totalorder (!%p329_p9), %s1042_s30, 31 }
  0x11   : > { %s368_s13 = sand.u32 (!%p329_p9), 1, %s1229_s16   ;;  %s967_s21 = scalar_lea.hbm (!%p329_p9), %s1613_s10, %s1318_s9 }
  0x12   : > { %s369_s22 = scalar_lea.vmem (!%p329_p9), [#allocation3], %s368_s13  ;;  %s971_s9 = sshll.u32 (!%p329_p9), %s967_s21, 4  ;;  %s972_s9 = int_to_ptr.hbm [resolvable:$true] %s971_s9 }
  0x13   : > { %s1189_s27 = sshra.s32 (!%p329_p9), %s972_s9, 4  ;;  %s1190_s27 = int_to_ptr.hbm [resolvable:$true] %s1189_s27 }
  0x14   : > { %s1191_s28 = scalar_lea.hbm (!%p329_p9), %s1190_s27, 1  ;;  %p1196_p0 = scmp.lt.s32.totalorder (!%p329_p9), %s1190_s27, %s1613_s10 }
  0x15   : > { %v1113_v0 = vld [vmem:[%s1605_s2 + $0x8] sm:$0xff]  ;;  %v1112_v2 = vld [vmem:[%s1605_s2] sm:$0xff]  ;;  %s1621_s30 = smov (!%p371_p10, %s1042_s30), 31  ;;  %vm455_vm0 = vcmask 261120   ;;  %v1123_v34 = vld [vmem:[%s1609_s6 + $0x38] sm:$0xff]  ;;  %vm898_vm1 = vcmask 130112   ;;  %p1192_p11 = scmp.ne.s32.totalorder %s1190_s27, %s1191_s28 }
  0x16   : > { %v1115_v1 = vld [vmem:[%s1607_s4 + $0x8] sm:$0xff]  ;;  %486 = vmatpush.bf16.msra.mxu0 %v1113_v0  ;;  %v1114_v3 = vld [vmem:[%s1607_s4] sm:$0xff]  ;;  %s1043_s19 = sshll.u32 %s1621_s30, 3  ;;  %742 = vmatpush.bf16.msra.mxu2 %v1123_v34  ;;  %v1122_v41 = vld [vmem:[%s1609_s6 + $0x30] sm:$0xff]  ;;  %vm902_vm2 = vcmask 195712   ;;  %vm906_vm3 = vcmask 261312  }
  0x17   : > { %591 = vmatpush.bf16.msra.mxu1 %v1115_v1  ;;  %s1361_s26 = scalar_lea.vmem %s1603_s0, %s1043_s19  ;;  %s1366_s29 = scalar_lea.vmem %s1604_s1, %s1043_s19  ;;  %1124 = vmatpush.bf16.msra.mxu3 %v1123_v34  ;;  %v1121_v42 = vld [vmem:[%s1609_s6 + $0x28] sm:$0xff]  ;;  %v1120_v43 = vld [vmem:[%s1609_s6 + $0x20] sm:$0xff]  ;;  %v1119_v50 = vld [vmem:[%s1609_s6 + $0x18] sm:$0xff]  ;;  %vm910_vm4 = vcmask 326912   ;;  %vm914_vm5 = vcmask 392512   ;;  %vm918_vm6 = vcmask 458112  }
  0x18   : > { %v383_v4 = vld [vmem:[%s1361_s26] sm:$0xff]  ;;  %v384_v5 = vld [vmem:[%s1361_s26 + $0x8] sm:$0xff]  ;;  %v385_v10 = vld [vmem:[%s1361_s26 + $0x10] sm:$0xff]  ;;  %vm922_vm7 = vcmask 523712   ;;  %vm926_vm8 = vcmask 589312   ;;  %vm930_vm9 = vcmask 654912   ;;  %p1193_p12 = pnand %p1192_p11, %p1335_p5 }
  0x19   : > { %v411_v6 = vld [vmem:[%s1366_s29] sm:$0xff]  ;;  %v399_v7 = vpack.c.bf16 %v384_v5, %v383_v4  ;;  %v412_v8 = vld [vmem:[%s1366_s29 + $0x8] sm:$0xff]  ;;  %v386_v11 = vld [vmem:[%s1361_s26 + $0x18] sm:$0xff]  ;;  %vm934_vm10 = vcmask 720512   ;;  %vm938_vm11 = vcmask 786112   ;;  %vm942_vm12 = vcmask 851712  }
  0x1a   : > { %487 = vmatpush.bf16.msra.mxu0 %v1112_v2  ;;  %v427_v9 = vpack.c.bf16 %v412_v8, %v411_v6  ;;  %v413_v12 = vld [vmem:[%s1366_s29 + $0x10] sm:$0xff]  ;;  %v414_v13 = vld [vmem:[%s1366_s29 + $0x18] sm:$0xff]  ;;  %v400_v14 = vpack.c.bf16 %v386_v11, %v385_v10  ;;  %v387_v16 = vld [vmem:[%s1361_s26 + $0x20] sm:$0xff]  ;;  %743 = vmatpush.bf16.msra.mxu2 %v1122_v41  ;;  %vm946_vm13 = vcmask 917312   ;;  %vm950_vm14 = vcmask 982912   ;;  %p1194_p13 = pneg %p1193_p12 }
  0x1b   : > { %592 = vmatpush.bf16.msra.mxu1 %v1114_v3  ;;  %v428_v15 = vpack.c.bf16 %v414_v13, %v413_v12  ;;  %v388_v17 = vld [vmem:[%s1361_s26 + $0x28] sm:$0xff]  ;;  %v415_v18 = vld [vmem:[%s1366_s29 + $0x20] sm:$0xff]  ;;  %v389_v22 = vld [vmem:[%s1361_s26 + $0x30] sm:$0xff]  ;;  %1125 = vmatpush.bf16.msra.mxu3 %v1122_v41  ;;  %vm954_vm15 = vcmask 1048512  }
  0x1c   : > { %v416_v19 = vld [vmem:[%s1366_s29 + $0x28] sm:$0xff]  ;;  %v401_v20 = vpack.c.bf16 %v388_v17, %v387_v16  ;;  %v390_v23 = vld [vmem:[%s1361_s26 + $0x38] sm:$0xff]  ;;  %v417_v24 = vld [vmem:[%s1366_s29 + $0x30] sm:$0xff] }
  0x1d   : > { %1054 = vmatmul.msk.bf16.vlgmr.msra.gmra.mxu0 %vm455_vm0, %v399_v7  ;;  %v429_v21 = vpack.c.bf16 %v416_v19, %v415_v18  ;;  %v418_v25 = vld [vmem:[%s1366_s29 + $0x38] sm:$0xff]  ;;  %v402_v26 = vpack.c.bf16 %v390_v23, %v389_v22  ;;  %v391_v28 = vld [vmem:[%s1361_s26 + $0x40] sm:$0xff]  ;;  %v392_v29 = vld [vmem:[%s1361_s26 + $0x48] sm:$0xff] }
  0x1e   : > { %1070 = vmatmul.msk.bf16.vlgmr.msra.gmra.mxu1 %vm455_vm0, %v427_v9  ;;  %v430_v27 = vpack.c.bf16 %v418_v25, %v417_v24  ;;  %v419_v30 = vld [vmem:[%s1366_s29 + $0x40] sm:$0xff]  ;;  %v420_v31 = vld [vmem:[%s1366_s29 + $0x48] sm:$0xff]  ;;  %v403_v32 = vpack.c.bf16 %v392_v29, %v391_v28  ;;  %v393_v35 = vld [vmem:[%s1361_s26 + $0x50] sm:$0xff]  ;;  %744 = vmatpush.bf16.msra.mxu2 %v1121_v42 }
  0x1f   : > { %v431_v33 = vpack.c.bf16 %v420_v31, %v419_v30  ;;  %v394_v36 = vld [vmem:[%s1361_s26 + $0x58] sm:$0xff]  ;;  %v421_v37 = vld [vmem:[%s1366_s29 + $0x50] sm:$0xff]  ;;  %1126 = vmatpush.bf16.msra.mxu3 %v1121_v42  ;;  %v395_v44 = vld [vmem:[%s1361_s26 + $0x60] sm:$0xff] }
  0x20   : > { %v422_v38 = vld [vmem:[%s1366_s29 + $0x58] sm:$0xff]  ;;  %v404_v39 = vpack.c.bf16 %v394_v36, %v393_v35  ;;  %v396_v45 = vld [vmem:[%s1361_s26 + $0x68] sm:$0xff]  ;;  %v423_v46 = vld [vmem:[%s1366_s29 + $0x60] sm:$0xff] }
  0x21   : > { %v432_v40 = vpack.c.bf16 %v422_v38, %v421_v37  ;;  %v424_v47 = vld [vmem:[%s1366_s29 + $0x68] sm:$0xff]  ;;  %v405_v48 = vpack.c.bf16 %v396_v45, %v395_v44  ;;  %v1118_v51 = vld [vmem:[%s1609_s6 + $0x10] sm:$0xff]  ;;  %v398_v54 = vld [vmem:[%s1361_s26 + $0x78] sm:$0xff] }
  0x22   : > { %745 = vmatpush.bf16.msra.mxu2 %v1120_v43  ;;  %v433_v49 = vpack.c.bf16 %v424_v47, %v423_v46  ;;  %v1117_v52 = vld [vmem:[%s1609_s6 + $0x8] sm:$0xff]  ;;  %v397_v53 = vld [vmem:[%s1361_s26 + $0x70] sm:$0xff]  ;;  %v426_v56 = vld [vmem:[%s1366_s29 + $0x78] sm:$0xff]  ;;  %s969_s26 = sshll.u32 %s369_s22, 4  ;;  %s970_s26 = int_to_ptr.vmem [resolvable:$true] %s969_s26 }
  0x23   : > { %1127 = vmatpush.bf16.msra.mxu3 %v1120_v43  ;;  %v425_v55 = vld [vmem:[%s1366_s29 + $0x70] sm:$0xff]  ;;  %v1116_v57 = vld [vmem:[%s1609_s6] sm:$0xff]  ;;  %v406_v58 = vpack.c.bf16 %v398_v54, %v397_v53  ;;  %s959_s29 = scalar_lea.sflag [#allocation4], %s368_s13 }
  0x24   : > { %v434_v59 = vpack.c.bf16 %v426_v56, %v425_v55  ;;  %v1443_v62 = vld [vmem:[%s1606_s3] ss:$0 sm:$0xff] }
  0x25   : > { %v1448_v63 = vld [vmem:[%s1608_s5] ss:$0 sm:$0xff] }
  0x26   : > { %746 = vmatpush.bf16.msra.mxu2 %v1119_v50 }
  0x27   : > { %1128 = vmatpush.bf16.msra.mxu3 %v1119_v50 }
  0x2a   : > { %747 = vmatpush.bf16.msra.mxu2 %v1118_v51 }
  0x2b   : > { %1129 = vmatpush.bf16.msra.mxu3 %v1118_v51 }
  0x2d   : > { %1055 = vmatmul.msk.bf16.gmra.mxu0 %vm455_vm0, %v400_v14 }
  0x2e   : > { %1071 = vmatmul.msk.bf16.gmra.mxu1 %vm455_vm0, %v428_v15  ;;  %748 = vmatpush.bf16.msra.mxu2 %v1117_v52 }
  0x2f   : > { %1130 = vmatpush.bf16.msra.mxu3 %v1117_v52 }
  0x32   : > { %749 = vmatpush.bf16.msra.mxu2 %v1116_v57 }
  0x33   : > { %1131 = vmatpush.bf16.msra.mxu3 %v1116_v57 }
  0x3d   : > { %1056 = vmatmul.msk.bf16.gmra.mxu0 %vm455_vm0, %v401_v20 }
  0x3e   : > { %1072 = vmatmul.msk.bf16.gmra.mxu1 %vm455_vm0, %v429_v21 }
  0x4d   : > { %1057 = vmatmul.msk.bf16.gmra.mxu0 %vm455_vm0, %v402_v26 }
  0x4e   : > { %1073 = vmatmul.msk.bf16.gmra.mxu1 %vm455_vm0, %v430_v27 }
  0x5d   : > { %1058 = vmatmul.msk.bf16.gmra.mxu0 %vm455_vm0, %v403_v32 }
  0x5e   : > { %1074 = vmatmul.msk.bf16.gmra.mxu1 %vm455_vm0, %v431_v33 }
  0x6d   : > { %1059 = vmatmul.msk.bf16.gmra.mxu0 %vm455_vm0, %v404_v39 }
  0x6e   : > { %1075 = vmatmul.msk.bf16.gmra.mxu1 %vm455_vm0, %v432_v40 }
  0x7d   : > { %1060 = vmatmul.msk.bf16.gmra.mxu0 %vm455_vm0, %v405_v48 }
  0x7e   : > { %1076 = vmatmul.msk.bf16.gmra.mxu1 %vm455_vm0, %v433_v49 }
  0x8d   : > { %1061 = vmatmul.msk.bf16.gmra.mxu0 %vm455_vm0, %v406_v58 }
  0x8e   : > { %1077 = vmatmul.msk.bf16.gmra.mxu1 %vm455_vm0, %v434_v59 }
  0x9a   : > { %v489_v60 = vpop.f32.mrf.mxu0 }
  0x9b   : > { %v594_v61 = vpop.f32.mrf.mxu1  ;;  %v490_v0 = vadd.f32 %v1443_v62, %v489_v60 }
  0x9c   : > { %v595_v1 = vadd.f32 %v1448_v63, %v594_v61 }
  0x9d   : > { %v529_v5 = vmax.f32 %v490_v0, 0.0 }
  0x9e   : > { %v634_v6 = vmax.f32 %v595_v1, 0.0 }
  0xa0   : > { %v650_v10 = vadd.f32 %v634_v6, %v529_v5 }
  0xa2   : > { %v491_v2 = vpop.f32.mrf.mxu0 }
  0xa3   : > { %v492_v3 = vadd.f32 %v1443_v62, %v491_v2  ;;  %v596_v4 = vpop.f32.mrf.mxu1 }
  0xa4   : > { %v597_v7 = vadd.f32 %v1448_v63, %v596_v4 }
  0xa5   : > { %v530_v8 = vmax.f32 %v492_v3, 0.0 }
  0xa6   : > { %v635_v9 = vmax.f32 %v597_v7, 0.0 }
  0xa8   : > { %v651_v11 = vadd.f32 %v635_v9, %v530_v8 }
  0xaa   : > { %v494_v12 = vpop.f32.mrf.mxu0  ;;  %v666_v13 = vpack.c.bf16 %v651_v11, %v650_v10 }
  0xab   : > { %v599_v14 = vpop.f32.mrf.mxu1  ;;  %v495_v15 = vadd.f32 %v1443_v62, %v494_v12 }
  0xac   : > { %750 = vmatmul.bf16.vlgmr.msra.gmra.mxu2 %v666_v13  ;;  %v600_v16 = vadd.f32 %v1448_v63, %v599_v14 }
  0xad   : > { %v531_v20 = vmax.f32 %v495_v15, 0.0 }
  0xae   : > { %v636_v21 = vmax.f32 %v600_v16, 0.0 }
  0xb0   : > { %v652_v25 = vadd.f32 %v636_v21, %v531_v20 }
  0xb2   : > { %v496_v17 = vpop.f32.mrf.mxu0 }
  0xb3   : > { %v497_v18 = vadd.f32 %v1443_v62, %v496_v17  ;;  %v601_v19 = vpop.f32.mrf.mxu1 }
  0xb4   : > { %v602_v22 = vadd.f32 %v1448_v63, %v601_v19 }
  0xb5   : > { %v532_v23 = vmax.f32 %v497_v18, 0.0 }
  0xb6   : > { %v637_v24 = vmax.f32 %v602_v22, 0.0 }
  0xb8   : > { %v653_v26 = vadd.f32 %v637_v24, %v532_v23 }
  0xba   : > { %v499_v27 = vpop.f32.mrf.mxu0  ;;  %v667_v28 = vpack.c.bf16 %v653_v26, %v652_v25 }
  0xbb   : > { %v604_v29 = vpop.f32.mrf.mxu1  ;;  %v500_v30 = vadd.f32 %v1443_v62, %v499_v27 }
  0xbc   : > { %755 = vmatmul.bf16.gmra.mxu2 %v667_v28  ;;  %v605_v31 = vadd.f32 %v1448_v63, %v604_v29 }
  0xbd   : > { %v533_v35 = vmax.f32 %v500_v30, 0.0 }
  0xbe   : > { %v638_v36 = vmax.f32 %v605_v31, 0.0 }
  0xc0   : > { %v654_v40 = vadd.f32 %v638_v36, %v533_v35 }
  0xc2   : > { %v501_v32 = vpop.f32.mrf.mxu0 }
  0xc3   : > { %v502_v33 = vadd.f32 %v1443_v62, %v501_v32  ;;  %v606_v34 = vpop.f32.mrf.mxu1 }
  0xc4   : > { %v607_v37 = vadd.f32 %v1448_v63, %v606_v34 }
  0xc5   : > { %v534_v38 = vmax.f32 %v502_v33, 0.0 }
  0xc6   : > { %v639_v39 = vmax.f32 %v607_v37, 0.0 }
  0xc8   : > { %v655_v41 = vadd.f32 %v639_v39, %v534_v38 }
  0xca   : > { %v504_v42 = vpop.f32.mrf.mxu0  ;;  %v668_v43 = vpack.c.bf16 %v655_v41, %v654_v40 }
  0xcb   : > { %v609_v44 = vpop.f32.mrf.mxu1  ;;  %v505_v45 = vadd.f32 %v1443_v62, %v504_v42 }
  0xcc   : > { %760 = vmatmul.bf16.gmra.mxu2 %v668_v43  ;;  %v610_v46 = vadd.f32 %v1448_v63, %v609_v44 }
  0xcd   : > { %v535_v50 = vmax.f32 %v505_v45, 0.0 }
  0xce   : > { %v640_v51 = vmax.f32 %v610_v46, 0.0 }
  0xd0   : > { %v656_v55 = vadd.f32 %v640_v51, %v535_v50 }
  0xd2   : > { %v506_v47 = vpop.f32.mrf.mxu0 }
  0xd3   : > { %v507_v48 = vadd.f32 %v1443_v62, %v506_v47  ;;  %v611_v49 = vpop.f32.mrf.mxu1 }
  0xd4   : > { %v612_v52 = vadd.f32 %v1448_v63, %v611_v49 }
  0xd5   : > { %v536_v53 = vmax.f32 %v507_v48, 0.0 }
  0xd6   : > { %v641_v54 = vmax.f32 %v612_v52, 0.0 }
  0xd8   : > { %v657_v56 = vadd.f32 %v641_v54, %v536_v53 }
  0xda   : > { %v509_v57 = vpop.f32.mrf.mxu0  ;;  %v669_v58 = vpack.c.bf16 %v657_v56, %v656_v55  ;;  %v1485_v56 = vld [vmem:[%s1610_s7] ss:$0 sm:$0xff] }
  0xdb   : > { %v614_v59 = vpop.f32.mrf.mxu1  ;;  %v510_v60 = vadd.f32 %v1443_v62, %v509_v57 }
  0xdc   : > { %765 = vmatmul.bf16.gmra.mxu2 %v669_v58  ;;  %v615_v61 = vadd.f32 %v1448_v63, %v614_v59 }
  0xdd   : > { %v537_v3 = vmax.f32 %v510_v60, 0.0 }
  0xde   : > { %v642_v4 = vmax.f32 %v615_v61, 0.0 }
  0xe0   : > { %v658_v8 = vadd.f32 %v642_v4, %v537_v3 }
  0xe2   : > { %v511_v0 = vpop.f32.mrf.mxu0 }
  0xe3   : > { %v512_v1 = vadd.f32 %v1443_v62, %v511_v0  ;;  %v616_v2 = vpop.f32.mrf.mxu1 }
  0xe4   : > { %v617_v5 = vadd.f32 %v1448_v63, %v616_v2 }
  0xe5   : > { %v538_v6 = vmax.f32 %v512_v1, 0.0 }
  0xe6   : > { %v643_v7 = vmax.f32 %v617_v5, 0.0 }
  0xe8   : > { %v659_v9 = vadd.f32 %v643_v7, %v538_v6 }
  0xea   : > { %v514_v10 = vpop.f32.mrf.mxu0  ;;  %v670_v11 = vpack.c.bf16 %v659_v9, %v658_v8 }
  0xeb   : > { %v619_v12 = vpop.f32.mrf.mxu1  ;;  %v515_v13 = vadd.f32 %v1443_v62, %v514_v10 }
  0xec   : > { %770 = vmatmul.bf16.gmra.mxu2 %v670_v11  ;;  %v620_v14 = vadd.f32 %v1448_v63, %v619_v12 }
  0xed   : > { %v539_v18 = vmax.f32 %v515_v13, 0.0 }
  0xee   : > { %v644_v19 = vmax.f32 %v620_v14, 0.0 }
  0xf0   : > { %v660_v23 = vadd.f32 %v644_v19, %v539_v18 }
  0xf2   : > { %v516_v15 = vpop.f32.mrf.mxu0 }
  0xf3   : > { %v517_v16 = vadd.f32 %v1443_v62, %v516_v15  ;;  %v621_v17 = vpop.f32.mrf.mxu1 }
  0xf4   : > { %v622_v20 = vadd.f32 %v1448_v63, %v621_v17 }
  0xf5   : > { %v540_v21 = vmax.f32 %v517_v16, 0.0 }
  0xf6   : > { %v645_v22 = vmax.f32 %v622_v20, 0.0 }
  0xf8   : > { %v661_v24 = vadd.f32 %v645_v22, %v540_v21 }
  0xfa   : > { %v519_v25 = vpop.f32.mrf.mxu0  ;;  %v671_v26 = vpack.c.bf16 %v661_v24, %v660_v23 }
  0xfb   : > { %v624_v27 = vpop.f32.mrf.mxu1  ;;  %v520_v28 = vadd.f32 %v1443_v62, %v519_v25 }
  0xfc   : > { %775 = vmatmul.bf16.gmra.mxu2 %v671_v26  ;;  %v625_v29 = vadd.f32 %v1448_v63, %v624_v27 }
  0xfd   : > { %v541_v33 = vmax.f32 %v520_v28, 0.0 }
  0xfe   : > { %v646_v34 = vmax.f32 %v625_v29, 0.0 }
 0x100   : > { %v662_v38 = vadd.f32 %v646_v34, %v541_v33 }
 0x102   : > { %v521_v30 = vpop.f32.mrf.mxu0 }
 0x103   : > { %v522_v31 = vadd.f32 %v1443_v62, %v521_v30  ;;  %v626_v32 = vpop.f32.mrf.mxu1 }
 0x104   : > { %v627_v35 = vadd.f32 %v1448_v63, %v626_v32 }
 0x105   : > { %v542_v36 = vmax.f32 %v522_v31, 0.0 }
 0x106   : > { %v647_v37 = vmax.f32 %v627_v35, 0.0 }
 0x108   : > { %v663_v39 = vadd.f32 %v647_v37, %v542_v36 }
 0x10a   : > { %v524_v40 = vpop.f32.mrf.mxu0  ;;  %v672_v41 = vpack.c.bf16 %v663_v39, %v662_v38 }
 0x10b   : > { %v629_v42 = vpop.f32.mrf.mxu1  ;;  %v525_v43 = vadd.f32 %v1443_v62, %v524_v40 }
 0x10c   : > { %780 = vmatmul.bf16.vlgmr.msra.gmra.mxu3 %v672_v41  ;;  %v630_v44 = vadd.f32 %v1448_v63, %v629_v42 }
 0x10d   : > { %v543_v48 = vmax.f32 %v525_v43, 0.0 }
 0x10e   : > { %v648_v49 = vmax.f32 %v630_v44, 0.0 }
 0x110   : > { %v664_v53 = vadd.f32 %v648_v49, %v543_v48 }
 0x112   : > { %v526_v45 = vpop.f32.mrf.mxu0 }
 0x113   : > { %v527_v46 = vadd.f32 %v1443_v62, %v526_v45  ;;  %v631_v47 = vpop.f32.mrf.mxu1  ;;  %v1491_v62 = vld [vmem:[%s1611_s8] ss:$0 sm:$0xff] }
 0x114   : > { %v632_v50 = vadd.f32 %v1448_v63, %v631_v47 }
 0x115   : > { %v544_v51 = vmax.f32 %v527_v46, 0.0 }
 0x116   : > { %v649_v52 = vmax.f32 %v632_v50, 0.0 }
 0x118   : > { %v665_v54 = vadd.f32 %v649_v52, %v544_v51 }
 0x11a   : > { %v673_v55 = vpack.c.bf16 %v665_v54, %v664_v53 }
 0x11c   : > { %785 = vmatmul.bf16.gmra.mxu3 %v673_v55 }
 0x12f   : > { %v751_v57 = vpop.f32.mrf.mxu2 }
 0x130   : > { %v752_v58 = vadd.f32 %v1485_v56, %v751_v57 }
 0x132   : > { %v791_v63 = vmax.f32 %v752_v58, 0.0 }
 0x134   : > { %v811_v59 = vmul.f32 %v1491_v62, %v791_v63 }
 0x136   : > { %827 = vadd.xlane.f32.xlu0 %v811_v59 }
 0x137   : > { %v753_v60 = vpop.f32.mrf.mxu2 }
 0x138   : > { %v754_v61 = vadd.f32 %v1485_v56, %v753_v60 }
 0x13a   : > { %v792_v0 = vmax.f32 %v754_v61, 0.0 }
 0x13c   : > { %v812_v1 = vmul.f32 %v1491_v62, %v792_v0 }
 0x13e   : > { %829 = vadd.xlane.f32.xlu0 %v812_v1 }
 0x13f   : > { %v756_v2 = vpop.f32.mrf.mxu2 }
 0x140   : > { %v757_v3 = vadd.f32 %v1485_v56, %v756_v2  ;;  %v893_v2 = vlaneseq }
 0x142   : > { %v793_v4 = vmax.f32 %v757_v3, 0.0 }
 0x144   : > { %v813_v5 = vmul.f32 %v1491_v62, %v793_v4 }
 0x146   : > { %831 = vadd.xlane.f32.xlu1 %v813_v5 }
 0x147   : > { %v758_v6 = vpop.f32.mrf.mxu2 }
 0x148   : > { %v759_v7 = vadd.f32 %v1485_v56, %v758_v6  ;;  %v1524_v6 = vand.u32 127, %v893_v2 }
 0x14a   : > { %v794_v8 = vmax.f32 %v759_v7, 0.0  ;;  %v1526_v7 = vstv %s859_s12  ;;  %v952_v2 = vadd.s32 4294967176, %v1524_v6  ;;  %s1195_s12 = scalar_lea.hbm %s1613_s10, 2 }
 0x14b   : > { %p1197_p1 = scmp.lt.s32.totalorder %s1195_s12, %s1191_s28 }
 0x14c   : > { %v814_v9 = vmul.f32 %v1491_v62, %v794_v8 }
 0x14d   : > { %p1198_p2 = por %p1197_p1, %p1196_p0 }
 0x14e   : > { %833 = vadd.xlane.f32.xlu1 %v814_v9  ;;  %v900_v9 = vadd.s32 4294967280, %v1524_v6 }
 0x14f   : > { %v761_v10 = vpop.f32.mrf.mxu2  ;;  %p1199_p3 = pnand %p1198_p2, %p1194_p13 }
 0x150   : > { %v762_v11 = vadd.f32 %v1485_v56, %v761_v10 }
 0x152   : > { %v795_v12 = vmax.f32 %v762_v11, 0.0  ;;  %v904_v11 = vadd.s32 4294967272, %v1524_v6 }
 0x154   : > { %v815_v13 = vmul.f32 %v1491_v62, %v795_v12 }
 0x156   : > { %835 = vadd.xlane.f32.xlu2 %v815_v13 }
 0x157   : > { %v763_v14 = vpop.f32.mrf.mxu2 }
 0x158   : > { %v764_v15 = vadd.f32 %v1485_v56, %v763_v14 }
 0x15a   : > { %v796_v16 = vmax.f32 %v764_v15, 0.0 }
 0x15c   : > { %v816_v17 = vmul.f32 %v1491_v62, %v796_v16  ;;  %v908_v16 = vadd.s32 4294967264, %v1524_v6 }
 0x15e   : > { %837 = vadd.xlane.f32.xlu2 %v816_v17 }
 0x15f   : > { %v766_v18 = vpop.f32.mrf.mxu2 }
 0x160   : > { %v767_v19 = vadd.f32 %v1485_v56, %v766_v18 }
 0x162   : > { %v797_v20 = vmax.f32 %v767_v19, 0.0 }
 0x164   : > { %v817_v21 = vmul.f32 %v1491_v62, %v797_v20 }
 0x166   : > { %839 = vadd.xlane.f32.xlu0 %v817_v21 }
 0x167   : > { %v768_v22 = vpop.f32.mrf.mxu2 }
 0x168   : > { %v769_v23 = vadd.f32 %v1485_v56, %v768_v22  ;;  %v912_v22 = vadd.s32 4294967256, %v1524_v6 }
 0x16a   : > { %v798_v24 = vmax.f32 %v769_v23, 0.0 }
 0x16c   : > { %v818_v25 = vmul.f32 %v1491_v62, %v798_v24 }
 0x16e   : > { %841 = vadd.xlane.f32.xlu1 %v818_v25  ;;  %v916_v25 = vadd.s32 4294967248, %v1524_v6 }
 0x16f   : > { %v771_v26 = vpop.f32.mrf.mxu2 }
 0x170   : > { %v772_v27 = vadd.f32 %v1485_v56, %v771_v26 }
 0x172   : > { %v799_v28 = vmax.f32 %v772_v27, 0.0 }
 0x174   : > { %v819_v29 = vmul.f32 %v1491_v62, %v799_v28  ;;  %v920_v28 = vadd.s32 4294967240, %v1524_v6 }
 0x176   : > { %843 = vadd.xlane.f32.xlu2 %v819_v29 }
 0x177   : > { %v773_v30 = vpop.f32.mrf.mxu2 }
 0x178   : > { %v774_v31 = vadd.f32 %v1485_v56, %v773_v30 }
 0x17a   : > { %v800_v32 = vmax.f32 %v774_v31, 0.0  ;;  %v924_v31 = vadd.s32 4294967232, %v1524_v6 }
 0x17c   : > { %v820_v33 = vmul.f32 %v1491_v62, %v800_v32 }
 0x17e   : > { %845 = vadd.xlane.f32.xlu0 %v820_v33 }
 0x17f   : > { %v776_v34 = vpop.f32.mrf.mxu2 }
 0x180   : > { %v777_v35 = vadd.f32 %v1485_v56, %v776_v34 }
 0x182   : > { %v801_v36 = vmax.f32 %v777_v35, 0.0  ;;  %v928_v35 = vadd.s32 4294967224, %v1524_v6 }
 0x184   : > { %v821_v37 = vmul.f32 %v1491_v62, %v801_v36 }
 0x186   : > { %847 = vadd.xlane.f32.xlu1 %v821_v37 }
 0x187   : > { %v778_v38 = vpop.f32.mrf.mxu2 }
 0x188   : > { %v779_v39 = vadd.f32 %v1485_v56, %v778_v38 }
 0x18a   : > { %v802_v40 = vmax.f32 %v779_v39, 0.0  ;;  %v932_v39 = vadd.s32 4294967216, %v1524_v6 }
 0x18c   : > { %v822_v41 = vmul.f32 %v1491_v62, %v802_v40 }
 0x18e   : > { %849 = vadd.xlane.f32.xlu2 %v822_v41 }
 0x18f   : > { %v781_v42 = vpop.f32.mrf.mxu3 }
 0x190   : > { %v782_v43 = vadd.f32 %v1485_v56, %v781_v42 }
 0x192   : > { %v803_v44 = vmax.f32 %v782_v43, 0.0 }
 0x194   : > { %v823_v45 = vmul.f32 %v1491_v62, %v803_v44  ;;  %v936_v44 = vadd.s32 4294967208, %v1524_v6 }
 0x196   : > { %851 = vadd.xlane.f32.xlu0 %v823_v45 }
 0x197   : > { %v783_v46 = vpop.f32.mrf.mxu3 }
 0x198   : > { %v784_v47 = vadd.f32 %v1485_v56, %v783_v46 }
 0x19a   : > { %v804_v48 = vmax.f32 %v784_v47, 0.0 }
 0x19c   : > { %v824_v49 = vmul.f32 %v1491_v62, %v804_v48  ;;  %v940_v48 = vadd.s32 4294967200, %v1524_v6 }
 0x19e   : > { %853 = vadd.xlane.f32.xlu1 %v824_v49 }
 0x19f   : > { %v786_v50 = vpop.f32.mrf.mxu3 }
 0x1a0   : > { %v787_v51 = vadd.f32 %v1485_v56, %v786_v50 }
 0x1a2   : > { %v805_v52 = vmax.f32 %v787_v51, 0.0 }
 0x1a4   : > { %v825_v53 = vmul.f32 %v1491_v62, %v805_v52  ;;  %v944_v52 = vadd.s32 4294967192, %v1524_v6 }
 0x1a6   : > { %855 = vadd.xlane.f32.xlu2 %v825_v53 }
 0x1a7   : > { %v788_v54 = vpop.f32.mrf.mxu3 }
 0x1a8   : > { %v789_v55 = vadd.f32 %v1485_v56, %v788_v54  ;;  %v896_v56 = vadd.s32 4294967288, %v1524_v6 }
 0x1a9   : > { %v828_v63 = vpop.xlane.xlu0 %827 }
 0x1aa   : > { %v806_v57 = vmax.f32 %v789_v55, 0.0  ;;  %v861_v8 = vadd.f32 %v1526_v7, %v828_v63 }
 0x1ac   : > { %v826_v58 = vmul.f32 %v1491_v62, %v806_v57  ;;  %v895_v19 = vperm.slane %v861_v8, %v1524_v6  ;;  %v948_v57 = vadd.s32 4294967184, %v1524_v6 }
 0x1ae   : > { %857 = vadd.xlane.f32.xlu0 %v826_v58 }
 0x1b1   : > { %v830_v61 = vpop.xlane.xlu0 %829 }
 0x1b2   : > { %v862_v62 = vadd.f32 %v1526_v7, %v830_v61 }
 0x1b4   : > { %v897_v14 = vperm.slane %v862_v62, %v896_v56 }
 0x1b6   : > { %v899_v24 = vsel %vm898_vm1, %v897_v14, %v895_v19 }
 0x1b9   : > { %v832_v59 = vpop.xlane.xlu1 %831 }
 0x1ba   : > { %v863_v10 = vadd.f32 %v1526_v7, %v832_v59 }
 0x1bc   : > { %v901_v20 = vperm.slane %v863_v10, %v900_v9 }
 0x1be   : > { %v903_v30 = vsel %vm902_vm2, %v901_v20, %v899_v24 }
 0x1c1   : > { %v834_v0 = vpop.xlane.xlu1 %833 }
 0x1c2   : > { %v864_v12 = vadd.f32 %v1526_v7, %v834_v0 }
 0x1c4   : > { %v905_v21 = vperm.slane %v864_v12, %v904_v11 }
 0x1c6   : > { %v907_v33 = vsel %vm906_vm3, %v905_v21, %v903_v30 }
 0x1c9   : > { %v836_v60 = vpop.xlane.xlu2 %835 }
 0x1ca   : > { %v865_v17 = vadd.f32 %v1526_v7, %v836_v60 }
 0x1cc   : > { %v909_v27 = vperm.slane %v865_v17, %v908_v16 }
 0x1ce   : > { %v911_v42 = vsel %vm910_vm4, %v909_v27, %v907_v33 }
 0x1d1   : > { %v838_v1 = vpop.xlane.xlu2 %837 }
 0x1d2   : > { %v866_v23 = vadd.f32 %v1526_v7, %v838_v1 }
 0x1d4   : > { %v913_v34 = vperm.slane %v866_v23, %v912_v22 }
 0x1d6   : > { %v915_v50 = vsel %vm914_vm5, %v913_v34, %v911_v42 }
 0x1d9   : > { %v840_v3 = vpop.xlane.xlu0 %839 }
 0x1da   : > { %v867_v26 = vadd.f32 %v1526_v7, %v840_v3 }
 0x1dc   : > { %v917_v38 = vperm.slane %v867_v26, %v916_v25 }
 0x1de   : > { %v919_v54 = vsel %vm918_vm6, %v917_v38, %v915_v50 }
 0x1e1   : > { %v842_v4 = vpop.xlane.xlu1 %841 }
 0x1e2   : > { %v868_v29 = vadd.f32 %v1526_v7, %v842_v4 }
 0x1e4   : > { %v921_v43 = vperm.slane %v868_v29, %v920_v28 }
 0x1e6   : > { %v923_v63 = vsel %vm922_vm7, %v921_v43, %v919_v54 }
 0x1e9   : > { %v844_v5 = vpop.xlane.xlu2 %843 }
 0x1ea   : > { %v869_v32 = vadd.f32 %v1526_v7, %v844_v5 }
 0x1ec   : > { %v925_v47 = vperm.slane %v869_v32, %v924_v31 }
 0x1ee   : > { %v927_v60 = vsel %vm926_vm8, %v925_v47, %v923_v63 }
 0x1f1   : > { %v846_v13 = vpop.xlane.xlu0 %845 }
 0x1f2   : > { %v870_v36 = vadd.f32 %v1526_v7, %v846_v13 }
 0x1f4   : > { %v929_v51 = vperm.slane %v870_v36, %v928_v35 }
 0x1f6   : > { %v931_v0 = vsel %vm930_vm9, %v929_v51, %v927_v60 }
 0x1f9   : > { %v848_v15 = vpop.xlane.xlu1 %847 }
 0x1fa   : > { %v871_v40 = vadd.f32 %v1526_v7, %v848_v15 }
 0x1fc   : > { %v933_v55 = vperm.slane %v871_v40, %v932_v39 }
 0x1fe   : > { %v935_v3 = vsel %vm934_vm10, %v933_v55, %v931_v0 }
 0x201   : > { %v850_v18 = vpop.xlane.xlu2 %849 }
 0x202   : > { %v872_v45 = vadd.f32 %v1526_v7, %v850_v18 }
 0x204   : > { %v937_v59 = vperm.slane %v872_v45, %v936_v44 }
 0x206   : > { %v939_v56 = vsel %vm938_vm11, %v937_v59, %v935_v3 }
 0x209   : > { %v852_v37 = vpop.xlane.xlu0 %851 }
 0x20a   : > { %v873_v49 = vadd.f32 %v1526_v7, %v852_v37 }
 0x20c   : > { %v941_v61 = vperm.slane %v873_v49, %v940_v48 }
 0x20e   : > { %v943_v8 = vsel %vm942_vm12, %v941_v61, %v939_v56 }
 0x211   : > { %v854_v41 = vpop.xlane.xlu1 %853 }
 0x212   : > { %v874_v53 = vadd.f32 %v1526_v7, %v854_v41 }
 0x214   : > { %v945_v1 = vperm.slane %v874_v53, %v944_v52 }
 0x216   : > { %v947_v9 = vsel %vm946_vm13, %v945_v1, %v943_v8 }
 0x219   : > { %v856_v46 = vpop.xlane.xlu2 %855 }
 0x21a   : > { %v875_v58 = vadd.f32 %v1526_v7, %v856_v46 }
 0x21c   : > { %v949_v4 = vperm.slane %v875_v58, %v948_v57 }
 0x21e   : > { %v951_v11 = vsel %vm950_vm14, %v949_v4, %v947_v9 }
 0x221   : > { %v858_v5 = vpop.xlane.xlu0 %857 }
 0x222   : > { %v876_v62 = vadd.f32 %v1526_v7, %v858_v5 }
 0x224   : > { %v953_v10 = vperm.slane %v876_v62, %v952_v2 }
 0x226   : > { %v955_v6 = vsel %vm954_vm15, %v953_v10, %v951_v11 }
 0x227   : > { %957 = vst [vmem:[%s369_s22] sm:$0x1] %v955_v6 }
 0x228   : > { %1202 = shalt.err (!%p1199_p3)
}
 0x229   : > { %1132 = dma.vmem_to_hbm [thread:$0]  (%p1335_p5), %s970_s26, 16, %s972_s9, %s959_s29  }
 0x22a PF: > { %p1138_p4 = scmp.ge.s32.totalorder %s1237_s18, 2  ;;  %s983_s13 = sand.u32 1, %s1225_s15  }
 0x22b   : > { %s984_s21 = scalar_lea.sflag [#allocation4], %s983_s13 }
 0x22c   : > { %p1135_p7 = pnand %p1138_p4, %p1339_p6 }
 0x22e   : > { %p1136_p8 = pneg %p1135_p7 }
 0x230   : > { %1220 = dma.done.wait (%p1136_p8), %s984_s21, 16  }
 0x231   : > { %1222 = vsyncadd (%p1136_p8), %s984_s21, 4294967280  ;;  %p21_p9 = scmp.ge.s32.totalorder %s1322_s20, 4   ;;  %s1616_s15 = smov %s1229_s16 }
 0x232   : > { %s1617_s16 = smov %s1233_s17  ;;  %s1618_s17 = smov %s1333_s23 }
 0x233   : > { %s1619_s18 = smov %s1322_s20  ;;  %23 = sbr.rel (!%p21_p9) target bundleno = 5 (0x5), region = 98 }
 0x238   :  { %989 = vsyncpa [#allocation4], 1 }
 0x239   :  { %991 = vsyncpa [#allocation4 + $0x1], 1 }

</bundles_post_ra>
